<compile_context>
chip_gen: v5e
topology: v5e:2x2
jax: 0.10.0
libtpu: 0.0.40
codegen_flags: <defaults>
</compile_context>

<pallas_src>
import jax
import jax.numpy as jnp
import numpy as np
from jax.experimental import pallas as pl
from jax.experimental.pallas import tpu as pltpu


def _round_up(x, m):
    return (x + m - 1) // m * m


def gru_encode_kernel(x_ref, wi_ref, wh_ref, bias_ref, h0_ref, out_ref):
    """Whole-sequence GRU encode in one kernel invocation (no grid).

    x_ref    : (T*B, E)    gathered embeddings, time-major (row t*B + b)
    wi_ref   : (E,  3*HP)  packed [W_ir | W_iz | W_in]^T, one 128-lane bank per gate
    wh_ref   : (HP, 3*HP)  packed [W_hr | W_hz | W_hn]^T, rows/cols lane-padded
    bias_ref : (2,  3*HP)  row 0 = b_ih, row 1 = b_hh (bank-packed, f32)
    h0_ref   : (B,  HP)    initial hidden state, lane-padded with zeros
    out_ref  : (T, B, HP)  hidden state after every step (padded lanes stay zero)
    """
    T, B, HP = out_ref.shape

    # Hoisted input projection: one well-shaped MXU matmul covers every (t, b).
    gi_all = jnp.dot(x_ref[...], wi_ref[...],
                     preferred_element_type=jnp.float32) + bias_ref[0:1, :]

    wh = wh_ref[...]
    b_hh = bias_ref[1:2, :]
    h = h0_ref[...].astype(jnp.float32)                # (B, HP) recurrent carry

    # Serial recurrence, fully unrolled at trace time (T is small and static).
    # Per step: one (B, HP) x (HP, 3*HP) matmul + full-vreg gate math.
    for t in range(T):
        gi = gi_all[t * B:(t + 1) * B, :]              # (B, 3*HP) static slice
        gh = jnp.dot(h.astype(wh.dtype), wh,
                     preferred_element_type=jnp.float32) + b_hh

        i_r, i_z, i_n = gi[:, 0:HP], gi[:, HP:2 * HP], gi[:, 2 * HP:3 * HP]
        h_r, h_z, h_n = gh[:, 0:HP], gh[:, HP:2 * HP], gh[:, 2 * HP:3 * HP]

        r = jax.nn.sigmoid(i_r + h_r)
        z = jax.nn.sigmoid(i_z + h_z)
        n = jnp.tanh(i_n + r * h_n)
        h = (1.0 - z) * n + z * h                      # PyTorch GRU update

        out_ref[t] = h                                 # VMEM-resident output row


def pack_params(params, param_dtype=jnp.float32):
    """One-time repack of PyTorch-layout Embedding/GRU params into kernel layout.

    Each gate gets its own 128-lane bank: HP = round_up(H, 128), GP = 3*HP.
    Columns [g*HP, g*HP + H) of wi/wh/bias hold gate g (PyTorch order r, z, n);
    everything else is zero.  The zero padding is self-preserving through the
    GRU update (padded gi/gh columns are 0 -> r = z = 0.5, n = 0, padded hidden
    lanes stay exactly 0), and padded wh rows are zero so padded hidden lanes
    never leak into real ones.
    """
    emb = params["embedding"].astype(jnp.float32)          # (V, E)
    W_ih = params["W_ih"].astype(jnp.float32)              # (3H, E), rows [r|z|n]
    W_hh = params["W_hh"].astype(jnp.float32)              # (3H, H)
    b_ih = params["b_ih"].astype(jnp.float32)              # (3H,)
    b_hh = params["b_hh"].astype(jnp.float32)              # (3H,)
    V, E = emb.shape
    H = W_hh.shape[1]
    HP = _round_up(H, 128)
    GP = 3 * HP

    def pack_w(W, rows, rows_pad):
        out = jnp.zeros((rows_pad, GP), jnp.float32)
        for g in range(3):
            out = out.at[:rows, g * HP:g * HP + H].set(W[g * H:(g + 1) * H, :].T)
        return out.astype(param_dtype)

    def pack_b(b):
        out = jnp.zeros((GP,), jnp.float32)
        for g in range(3):
            out = out.at[g * HP:g * HP + H].set(b[g * H:(g + 1) * H])
        return out

    return {
        "emb": emb.astype(param_dtype),                    # (V, E)
        "wi": pack_w(W_ih, E, E),                          # (E,  GP)
        "wh": pack_w(W_hh, H, HP),                         # (HP, GP)
        "bias": jnp.stack([pack_b(b_ih), pack_b(b_hh)]),   # (2,  GP) f32
        "dims": (V, E, H, HP),
    }


def encoder_forward(word_ids, in_hidden, packed):
    """word_ids: (T, B) int32 token ids (seq-major, like nn.GRU's input layout).
    in_hidden:  (1, B, H) float32 initial hidden state.
    Returns (gru_out, out_hidden) with shapes (T, B, H) and (1, B, H).
    T = B = 1 matches the original Encoder.forward exactly."""
    V, E, H, HP = packed["dims"]
    T, B = word_ids.shape

    # Clamp token ids: TPU has no runtime OOB check, so an out-of-range gather
    # would silently read wrong rows (PyTorch would raise instead).
    words = jnp.clip(word_ids.astype(jnp.int32), 0, V - 1).reshape(T * B)

    # Embedding gather hoisted into the wrapper: one XLA gather feeding one
    # well-shaped in-kernel matmul (no per-step embedding DMA).
    x_all = jnp.take(packed["emb"], words, axis=0)                 # (T*B, E)

    h0 = jnp.pad(in_hidden.reshape(B, H).astype(jnp.float32),
                 ((0, 0), (0, HP - H)))                            # (B, HP)

    vmem = pl.BlockSpec(memory_space=pltpu.MemorySpace.VMEM)
    out_pad = pl.pallas_call(
        gru_encode_kernel,
        out_shape=jax.ShapeDtypeStruct((T, B, HP), jnp.float32),
        in_specs=[vmem, vmem, vmem, vmem, vmem],
        out_specs=vmem,
    )(x_all, packed["wi"], packed["wh"], packed["bias"], h0)

    gru_out = out_pad[:, :, :H]                        # drop lane padding
    out_hidden = gru_out[-1:]                          # final hidden (1, B, H)
    return gru_out, out_hidden


def reference_forward(word_ids, in_hidden, params):
    """Pure-JAX reference with PyTorch GRU semantics (seq-major, batched)."""
    H = params["W_hh"].shape[1]
    T, B = word_ids.shape
    h = in_hidden.reshape(B, H).astype(jnp.float32)
    outs = []
    for t in range(T):
        x = params["embedding"][word_ids[t]]                       # (B, E)
        gi = x @ params["W_ih"].T + params["b_ih"][None, :]        # (B, 3H)
        gh = h @ params["W_hh"].T + params["b_hh"][None, :]
        i_r, i_z, i_n = gi[:, :H], gi[:, H:2 * H], gi[:, 2 * H:]
        h_r, h_z, h_n = gh[:, :H], gh[:, H:2 * H], gh[:, 2 * H:]
        r = jax.nn.sigmoid(i_r + h_r)
        z = jax.nn.sigmoid(i_z + h_z)
        n = jnp.tanh(i_n + r * h_n)
        h = (1.0 - z) * n + z * h
        outs.append(h)
    gru_out = jnp.stack(outs, axis=0)                              # (T, B, H)
    return gru_out, gru_out[-1:]


def init_params(key, vocab_size, embedding_dim, hidden_dim):
    ks = jax.random.split(key, 5)
    bound = 1.0 / np.sqrt(hidden_dim)
    return {
        "embedding": jax.random.normal(ks[0], (vocab_size, embedding_dim), jnp.float32),
        "W_ih": jax.random.uniform(ks[1], (3 * hidden_dim, embedding_dim),
                                   jnp.float32, -bound, bound),
        "W_hh": jax.random.uniform(ks[2], (3 * hidden_dim, hidden_dim),
                                   jnp.float32, -bound, bound),
        "b_ih": jax.random.uniform(ks[3], (3 * hidden_dim,), jnp.float32, -bound, bound),
        "b_hh": jax.random.uniform(ks[4], (3 * hidden_dim,), jnp.float32, -bound, bound),
    }


if __name__ == "__main__":
    VOCAB, EMBED, HIDDEN, SEQ, BATCH = 64, 32, 32, 8, 4

    key = jax.random.PRNGKey(0)
    params = init_params(key, VOCAB, EMBED, HIDDEN)
    packed = pack_params(params)          # one-time parameter repack (f32 demo)

    # (a) Original single-step Encoder.forward semantics: one token, batch 1.
    in_hidden = jnp.zeros((1, 1, HIDDEN), jnp.float32)     # Encoder.init_hidden()
    in_word = jnp.array([[5]], dtype=jnp.int32)            # (T=1, B=1)
    out1, hid1 = encoder_forward(in_word, in_hidden, packed)
    out1 = jax.block_until_ready(out1)
    hid1 = jax.block_until_ready(hid1)
    ref_o1, ref_h1 = reference_forward(in_word, in_hidden, params)
    np.testing.assert_allclose(np.asarray(out1), np.asarray(ref_o1), rtol=1e-5, atol=1e-5)
    np.testing.assert_allclose(np.asarray(hid1), np.asarray(ref_h1), rtol=1e-5, atol=1e-5)

    # (b) Whole batched sentence encode in one kernel launch (no time grid).
    word_ids = jax.random.randint(jax.random.PRNGKey(1), (SEQ, BATCH), 0, VOCAB,
                                  dtype=jnp.int32)
    in_hidden_b = jnp.zeros((1, BATCH, HIDDEN), jnp.float32)
    outs, hid = encoder_forward(word_ids, in_hidden_b, packed)
    outs = jax.block_until_ready(outs)
    hid = jax.block_until_ready(hid)
    ref_outs, ref_hid = reference_forward(word_ids, in_hidden_b, params)
    np.testing.assert_allclose(np.asarray(outs), np.asarray(ref_outs), rtol=1e-5, atol=1e-5)
    np.testing.assert_allclose(np.asarray(hid), np.asarray(ref_hid), rtol=1e-5, atol=1e-5)

    print("KERNEL_OK")
</pallas_src>

<mosaic_0001>
module attributes {stable_mosaic.version = 11 : i64} {
  func.func @gru_encode_kernel(%arg0: memref<1x32xf32, #tpu.memory_space<vmem>>, %arg1: memref<32x384xf32, #tpu.memory_space<vmem>>, %arg2: memref<128x384xf32, #tpu.memory_space<vmem>>, %arg3: memref<2x384xf32, #tpu.memory_space<vmem>>, %arg4: memref<1x128xf32, #tpu.memory_space<vmem>>, %arg5: memref<1x1x128xf32, #tpu.memory_space<vmem>>) attributes {dimension_semantics = [], scalar_prefetch = 0 : i64, scratch_operands = 0 : i64, tpu.core_type = #tpu.core_type<tc>} {
    %c0 = arith.constant 0 : index
    %c0_0 = arith.constant 0 : index
    %0 = vector.load %arg0[%c0, %c0_0] : memref<1x32xf32, #tpu.memory_space<vmem>>, vector<1x32xf32>
    %c0_1 = arith.constant 0 : index
    %c0_2 = arith.constant 0 : index
    %1 = vector.load %arg1[%c0_1, %c0_2] : memref<32x384xf32, #tpu.memory_space<vmem>>, vector<32x384xf32>
    %cst = arith.constant dense<0.000000e+00> : vector<1x384xf32>
    %2 = tpu.matmul %0, %1, %cst {dimension_numbers = #tpu.dot_dimension_numbers<[1], [0], [0], [1], [0, 0, 1, 1], [], []>} : vector<1x32xf32>, vector<32x384xf32>, vector<1x384xf32> -> vector<1x384xf32>
    %c0_3 = arith.constant 0 : index
    %c0_4 = arith.constant 0 : index
    %3 = vector.load %arg3[%c0_3, %c0_4] : memref<2x384xf32, #tpu.memory_space<vmem>>, vector<1x384xf32>
    %4 = arith.addf %2, %3 : vector<1x384xf32>
    %c0_5 = arith.constant 0 : index
    %c0_6 = arith.constant 0 : index
    %5 = vector.load %arg2[%c0_5, %c0_6] : memref<128x384xf32, #tpu.memory_space<vmem>>, vector<128x384xf32>
    %c1 = arith.constant 1 : index
    %c0_7 = arith.constant 0 : index
    %6 = vector.load %arg3[%c1, %c0_7] : memref<2x384xf32, #tpu.memory_space<vmem>>, vector<1x384xf32>
    %c0_8 = arith.constant 0 : index
    %c0_9 = arith.constant 0 : index
    %7 = vector.load %arg4[%c0_8, %c0_9] : memref<1x128xf32, #tpu.memory_space<vmem>>, vector<1x128xf32>
    %cst_10 = arith.constant dense<0.000000e+00> : vector<1x384xf32>
    %8 = tpu.matmul %7, %5, %cst_10 {dimension_numbers = #tpu.dot_dimension_numbers<[1], [0], [0], [1], [0, 0, 1, 1], [], []>} : vector<1x128xf32>, vector<128x384xf32>, vector<1x384xf32> -> vector<1x384xf32>
    %9 = arith.addf %8, %6 : vector<1x384xf32>
    %10 = vector.extract_strided_slice %4 {offsets = [0, 0], sizes = [1, 128], strides = [1, 1]} : vector<1x384xf32> to vector<1x128xf32>
    %11 = vector.extract_strided_slice %4 {offsets = [0, 128], sizes = [1, 128], strides = [1, 1]} : vector<1x384xf32> to vector<1x128xf32>
    %12 = vector.extract_strided_slice %4 {offsets = [0, 256], sizes = [1, 128], strides = [1, 1]} : vector<1x384xf32> to vector<1x128xf32>
    %13 = vector.extract_strided_slice %9 {offsets = [0, 0], sizes = [1, 128], strides = [1, 1]} : vector<1x384xf32> to vector<1x128xf32>
    %14 = vector.extract_strided_slice %9 {offsets = [0, 128], sizes = [1, 128], strides = [1, 1]} : vector<1x384xf32> to vector<1x128xf32>
    %15 = vector.extract_strided_slice %9 {offsets = [0, 256], sizes = [1, 128], strides = [1, 1]} : vector<1x384xf32> to vector<1x128xf32>
    %16 = arith.addf %10, %13 : vector<1x128xf32>
    %17 = arith.negf %16 : vector<1x128xf32>
    %18 = math.exp %17 : vector<1x128xf32>
    %cst_11 = arith.constant 1.000000e+00 : f32
    %19 = vector.broadcast %cst_11 : f32 to vector<1x128xf32>
    %20 = arith.addf %19, %18 : vector<1x128xf32>
    %21 = arith.divf %19, %20 : vector<1x128xf32>
    %22 = arith.addf %11, %14 : vector<1x128xf32>
    %23 = arith.negf %22 : vector<1x128xf32>
    %24 = math.exp %23 : vector<1x128xf32>
    %cst_12 = arith.constant 1.000000e+00 : f32
    %25 = vector.broadcast %cst_12 : f32 to vector<1x128xf32>
    %26 = arith.addf %25, %24 : vector<1x128xf32>
    %27 = arith.divf %25, %26 : vector<1x128xf32>
    %28 = arith.mulf %21, %15 : vector<1x128xf32>
    %29 = arith.addf %12, %28 : vector<1x128xf32>
    %30 = math.tanh %29 : vector<1x128xf32>
    %cst_13 = arith.constant 1.000000e+00 : f32
    %31 = vector.broadcast %cst_13 : f32 to vector<1x128xf32>
    %32 = arith.subf %31, %27 : vector<1x128xf32>
    %33 = arith.mulf %32, %30 : vector<1x128xf32>
    %34 = arith.mulf %27, %7 : vector<1x128xf32>
    %35 = arith.addf %33, %34 : vector<1x128xf32>
    %c0_14 = arith.constant 0 : index
    %c0_15 = arith.constant 0 : index
    %c0_16 = arith.constant 0 : index
    %36 = vector.load %arg5[%c0_14, %c0_15, %c0_16] : memref<1x1x128xf32, #tpu.memory_space<vmem>>, vector<1x1x128xf32>
    %37 = vector.shape_cast %36 : vector<1x1x128xf32> to vector<1x128xf32>
    %38 = vector.shape_cast %35 : vector<1x128xf32> to vector<1x1x128xf32>
    tpu.vector_store %arg5[%c0_14, %c0_15, %c0_16], %38 {strides = array<i32>} : memref<1x1x128xf32, #tpu.memory_space<vmem>>, vector<1x1x128xf32>,
    return
  }
}

</mosaic_0001>

<bundles_post_ra>
// kernel: tpu_custom_call.1
= control target key start
LH: loop header
LB: loop body
LE: loop exit
PB: predicated region body
PF: predicated region fallthrough
CT: control target
= control target key end

     0   :  { %10 = vsyncpa [#allocation3], 0  ;;  %s569_s0 = inlined_call_operand.hbm [shape: f32[1,32], index: 0, kind: input, shape index: {}]   ;;  %s570_s1 = inlined_call_operand.hbm [shape: f32[32,384], index: 1, kind: input, shape index: {}]   ;;  %s571_s2 = inlined_call_operand.hbm [shape: f32[128,384], index: 2, kind: input, shape index: {}]   ;;  %s572_s3 = inlined_call_operand.hbm [shape: f32[2,384], index: 3, kind: input, shape index: {}]   ;;  %s573_s4 = inlined_call_operand.vmem [shape: f32[1,128], index: 4, kind: input, shape index: {}]   ;;  %s574_s5 = inlined_call_operand.hbm [shape: f32[1,1,128], index: 5, kind: output, shape index: {}]  }
   0x1   :  { %11 = vsyncpa [#allocation6], 0 }
   0x2   :  { %12 = vsyncpa [#allocation9], 0  ;;  %s29_s20 = sshll.u32 %s570_s1, 4  ;;  %s30_s20 = int_to_ptr.hbm [resolvable:$true] %s29_s20 }
   0x3   :  { %13 = vsyncpa [#allocation4], 0  ;;  %s500_s21 = smov [#allocation5]   ;;  %s19_s25 = sshll.u32 %s569_s0, 4  ;;  %s20_s25 = int_to_ptr.hbm [resolvable:$true] %s19_s25 }
   0x4   :  { %s31_s22 = sshll.u32 %s500_s21, 4  ;;  %s501_s26 = smov 384   ;;  %s32_s22 = int_to_ptr.vmem [resolvable:$true] %s31_s22 }
   0x5   :  { %s502_s27 = smov 24   ;;  %s503_s28 = smov [#allocation2]  }
   0x6   :  { %37 = dma.hbm_to_vmem [thread:$0]  %s30_s20, 1536, %s32_s22, [#allocation6], %s501_s26, %s501_s26, %s502_s27  }
   0x7   :  { %s21_s29 = sshll.u32 %s503_s28, 4  ;;  %s42_s7 = sshll.u32 %s571_s2, 4  ;;  %s22_s29 = int_to_ptr.vmem [resolvable:$true] %s21_s29  ;;  %s43_s7 = int_to_ptr.hbm [resolvable:$true] %s42_s7 }
   0x8   :  { %24 = dma.hbm_to_vmem [thread:$0]  %s20_s25, 16, %s22_s29, [#allocation3]  }
   0x9   :  { %s56_s9 = sshll.u32 %s572_s3, 4  ;;  %s504_s10 = smov [#allocation7]   ;;  %s57_s9 = int_to_ptr.hbm [resolvable:$true] %s56_s9 }
   0xa   :  { %s44_s11 = sshll.u32 %s504_s10, 4  ;;  %s505_s0 = smov [#allocation8]   ;;  %s45_s11 = int_to_ptr.vmem [resolvable:$true] %s44_s11 }
   0xb   :  { %50 = dma.hbm_to_vmem [thread:$0]  %s43_s7, 6144, %s45_s11, [#allocation6], %s501_s26, %s501_s26, %s502_s27  }
   0xc   :  { %s58_s12 = sshll.u32 %s505_s0, 4  ;;  %s59_s12 = int_to_ptr.vmem [resolvable:$true] %s58_s12 }
   0xd   :  { %61 = dma.hbm_to_vmem [thread:$0]  %s57_s9, 96, %s59_s12, [#allocation9]  }
   0xe   :  { %492 = dma.done.wait [#allocation3], 16  }
   0xf   :  { %493 = vsyncadd [#allocation3], 4294967280 }
  0x10   :  { %494 = dma.done.wait [#allocation6], 7680  }
  0x11   :  { %495 = vsyncadd [#allocation6], 4294959616 }
  0x12   :  { %496 = dma.done.wait [#allocation9], 96  }
  0x13   :  { %497 = vsyncadd [#allocation9], 4294967200  ;;  %v210_v0 = vld [vmem:[#allocation7 + $0x168] sm:$0xff]  ;;  %v207_v1 = vld [vmem:[#allocation7 + $0x150] sm:$0xff]  ;;  %vm101_vm0 = vcmask 261120   ;;  %s338_s16 = sshll.u32 %s574_s5, 4  ;;  %s339_s16 = int_to_ptr.hbm [resolvable:$true] %s338_s16 }
  0x14   :  { %v211_v2 = vld [vmem:[#allocation7 + $0x170] sm:$0xff]  ;;  %223 = vmatpush.msra.mxu3 %v210_v0  ;;  %v208_v3 = vld [vmem:[#allocation7 + $0x158] sm:$0xff]  ;;  %v205_v5 = vld [vmem:[#allocation7 + $0x140] sm:$0xff] }
  0x15   :  { %243 = vmatpush.msra.mxu0 %v211_v2  ;;  %v204_v4 = vld [vmem:[#allocation7 + $0x138] sm:$0xff]  ;;  %v90_v6 = vld [vmem:[#allocation5 + $0x48] sm:$0xff]  ;;  %v201_v7 = vld [vmem:[#allocation7 + $0x120] sm:$0xff] }
  0x16   :  { %224 = vmatpush.msra.mxu3 %v207_v1  ;;  %v202_v8 = vld [vmem:[#allocation7 + $0x128] sm:$0xff]  ;;  %117 = vmatpush.msra.mxu2 %v90_v6  ;;  %v87_v9 = vld [vmem:[#allocation5 + $0x30] sm:$0xff]  ;;  %v84_v10 = vld [vmem:[#allocation5 + $0x18] sm:$0xff] }
  0x17   :  { %244 = vmatpush.msra.mxu0 %v208_v3  ;;  %v198_v11 = vld [vmem:[#allocation7 + $0x108] sm:$0xff]  ;;  %v199_v12 = vld [vmem:[#allocation7 + $0x110] sm:$0xff]  ;;  %v81_v13 = vld [vmem:[#allocation5] sm:$0xff] }
  0x18   :  { %225 = vmatpush.msra.mxu3 %v204_v4  ;;  %118 = vmatpush.msra.mxu2 %v87_v9  ;;  %v195_v14 = vld [vmem:[#allocation7 + $0xf0] sm:$0xff]  ;;  %v196_v15 = vld [vmem:[#allocation7 + $0xf8] sm:$0xff]  ;;  %v193_v18 = vld [vmem:[#allocation7 + $0xe0] sm:$0xff] }
  0x19   :  { %245 = vmatpush.msra.mxu0 %v205_v5  ;;  %v549_v16 = vld [vmem:[#allocation2] sm:$0x1]  ;;  %v91_v19 = vld [vmem:[#allocation5 + $0x50] sm:$0xff]  ;;  %v189_v20 = vld [vmem:[#allocation7 + $0xc0] sm:$0xff] }
  0x1a   :  { %226 = vmatpush.msra.mxu3 %v201_v7  ;;  %119 = vmatpush.msra.mxu2 %v84_v10  ;;  %v192_v17 = vld [vmem:[#allocation7 + $0xd8] sm:$0xff]  ;;  %v190_v21 = vld [vmem:[#allocation7 + $0xc8] sm:$0xff]  ;;  %v187_v24 = vld [vmem:[#allocation7 + $0xb0] sm:$0xff] }
  0x1b   :  { %246 = vmatpush.msra.mxu0 %v202_v8  ;;  %v88_v22 = vld [vmem:[#allocation5 + $0x38] sm:$0xff]  ;;  %v186_v23 = vld [vmem:[#allocation7 + $0xa8] sm:$0xff]  ;;  %v85_v26 = vld [vmem:[#allocation5 + $0x20] sm:$0xff] }
  0x1c   :  { %227 = vmatpush.msra.mxu3 %v198_v11  ;;  %120 = vmatpush.msra.mxu2 %v81_v13  ;;  %v212_v25 = vld [vmem:[#allocation7 + $0x178] sm:$0xff]  ;;  %v209_v27 = vld [vmem:[#allocation7 + $0x160] sm:$0xff]  ;;  %v183_v28 = vld [vmem:[#allocation7 + $0x90] sm:$0xff] }
  0x1d   :  { %247 = vmatpush.msra.mxu0 %v199_v12  ;;  %350 = vmatmul.msk.f32.vlgmr.msra.gmra.mxu2 %vm101_vm0, %v549_v16  ;;  %v184_v29 = vld [vmem:[#allocation7 + $0x98] sm:$0xff]  ;;  %v82_v30 = vld [vmem:[#allocation5 + $0x8] sm:$0xff]  ;;  %v181_v33 = vld [vmem:[#allocation7 + $0x80] sm:$0xff] }
  0x1e   :  { %228 = vmatpush.msra.mxu3 %v195_v14  ;;  %137 = vmatpush.msrb.mxu2 %v91_v19  ;;  %v206_v31 = vld [vmem:[#allocation7 + $0x148] sm:$0xff]  ;;  %v180_v32 = vld [vmem:[#allocation7 + $0x78] sm:$0xff]  ;;  %v203_v34 = vld [vmem:[#allocation7 + $0x130] sm:$0xff] }
  0x1f   :  { %248 = vmatpush.msra.mxu0 %v196_v15  ;;  %263 = vmatpush.msra.mxu1 %v212_v25  ;;  %v177_v35 = vld [vmem:[#allocation7 + $0x60] sm:$0xff]  ;;  %v178_v36 = vld [vmem:[#allocation7 + $0x68] sm:$0xff]  ;;  %v200_v37 = vld [vmem:[#allocation7 + $0x118] sm:$0xff] }
  0x20   :  { %229 = vmatpush.msra.mxu3 %v192_v17  ;;  %138 = vmatpush.msrb.mxu2 %v88_v22  ;;  %v92_v38 = vld [vmem:[#allocation5 + $0x58] sm:$0xff]  ;;  %v174_v39 = vld [vmem:[#allocation7 + $0x48] sm:$0xff]  ;;  %v175_v40 = vld [vmem:[#allocation7 + $0x50] sm:$0xff] }
  0x21   :  { %249 = vmatpush.msra.mxu0 %v193_v18  ;;  %264 = vmatpush.msra.mxu1 %v209_v27  ;;  %v197_v41 = vld [vmem:[#allocation7 + $0x100] sm:$0xff]  ;;  %v171_v43 = vld [vmem:[#allocation7 + $0x30] sm:$0xff]  ;;  %v172_v44 = vld [vmem:[#allocation7 + $0x38] sm:$0xff] }
  0x22   :  { %230 = vmatpush.msra.mxu3 %v189_v20  ;;  %139 = vmatpush.msrb.mxu2 %v85_v26  ;;  %v89_v42 = vld [vmem:[#allocation5 + $0x40] sm:$0xff]  ;;  %v194_v45 = vld [vmem:[#allocation7 + $0xe8] sm:$0xff]  ;;  %v168_v47 = vld [vmem:[#allocation7 + $0x18] sm:$0xff] }
  0x23   :  { %250 = vmatpush.msra.mxu0 %v190_v21  ;;  %265 = vmatpush.msra.mxu1 %v206_v31  ;;  %v86_v46 = vld [vmem:[#allocation5 + $0x28] sm:$0xff]  ;;  %v169_v48 = vld [vmem:[#allocation7 + $0x20] sm:$0xff]  ;;  %v191_v49 = vld [vmem:[#allocation7 + $0xd0] sm:$0xff] }
  0x24   :  { %231 = vmatpush.msra.mxu3 %v186_v23  ;;  %140 = vmatpush.msrb.mxu2 %v82_v30  ;;  %v83_v50 = vld [vmem:[#allocation5 + $0x10] sm:$0xff]  ;;  %v165_v51 = vld [vmem:[#allocation7] sm:$0xff]  ;;  %v166_v52 = vld [vmem:[#allocation7 + $0x8] sm:$0xff] }
  0x25   :  { %251 = vmatpush.msra.mxu0 %v187_v24  ;;  %351 = vmatmul.msk.f32.vlgmr.msrb.gmra.mxu2 %vm101_vm0, %v549_v16  ;;  %v558_v53 = vld [vmem:[%s573_s4] sm:$0x1]  ;;  %v185_v55 = vld [vmem:[#allocation7 + $0xa0] sm:$0xff]  ;;  %v182_v56 = vld [vmem:[#allocation7 + $0x88] sm:$0xff]  ;;  %s506_s4 = smov [#allocation10]  }
  0x26   :  { %232 = vmatpush.msra.mxu3 %v183_v28  ;;  %266 = vmatpush.msra.mxu1 %v203_v34  ;;  %v188_v54 = vld [vmem:[#allocation7 + $0xb8] sm:$0xff]  ;;  %v179_v57 = vld [vmem:[#allocation7 + $0x70] sm:$0xff]  ;;  %v173_v59 = vld [vmem:[#allocation7 + $0x40] sm:$0xff]  ;;  %s336_s13 = sshll.u32 %s506_s4, 4  ;;  %s337_s13 = int_to_ptr.vmem [resolvable:$true] %s336_s13 }
  0x27   :  { %252 = vmatpush.msra.mxu0 %v184_v29  ;;  %157 = vmatpush.msra.mxu2 %v92_v38  ;;  %v176_v58 = vld [vmem:[#allocation7 + $0x58] sm:$0xff]  ;;  %v170_v60 = vld [vmem:[#allocation7 + $0x28] sm:$0xff]  ;;  %v167_v61 = vld [vmem:[#allocation7 + $0x10] sm:$0xff] }
  0x28   :  { %233 = vmatpush.msra.mxu3 %v180_v32  ;;  %267 = vmatpush.msra.mxu1 %v200_v37  ;;  %v93_v63 = vld [vmem:[#allocation8] ss:$2 sm:$0x7]  ;;  %v214_v0 = vld [vmem:[#allocation8 + $0x1] ss:$2 sm:$0x7] }
  0x29   :  { %253 = vmatpush.msra.mxu0 %v181_v33  ;;  %158 = vmatpush.msra.mxu2 %v89_v42  ;;  %v96_v1 = vperm.slane %v93_v63, 1  ;;  %v218_v3 = vperm.slane %v214_v0, 1  ;;  %v95_v6 = vperm.slane %v93_v63, 0  ;;  %v217_v9 = vperm.slane %v214_v0, 0 }
  0x2a   :  { %234 = vmatpush.msra.mxu3 %v177_v35  ;;  %268 = vmatpush.msra.mxu1 %v197_v41  ;;  %v219_v25 = vperm.slane %v214_v0, 2  ;;  %v97_v31 = vperm.slane %v93_v63, 2 }
  0x2b   :  { %254 = vmatpush.msra.mxu0 %v178_v36  ;;  %159 = vmatpush.msra.mxu2 %v86_v46 }
  0x2c   :  { %235 = vmatpush.msra.mxu3 %v174_v39  ;;  %269 = vmatpush.msra.mxu1 %v194_v45 }
  0x2d   :  { %255 = vmatpush.msra.mxu0 %v175_v40  ;;  %160 = vmatpush.msra.mxu2 %v83_v50 }
  0x2e   :  { %236 = vmatpush.msra.mxu3 %v171_v43  ;;  %270 = vmatpush.msra.mxu1 %v191_v49 }
  0x2f   :  { %256 = vmatpush.msra.mxu0 %v172_v44  ;;  %352 = vmatmul.msk.f32.vlgmr.msra.gmra.mxu2 %vm101_vm0, %v549_v16 }
  0x30   :  { %237 = vmatpush.msra.mxu3 %v168_v47  ;;  %271 = vmatpush.msra.mxu1 %v188_v54 }
  0x31   :  { %257 = vmatpush.msra.mxu0 %v169_v48 }
  0x32   :  { %238 = vmatpush.msra.mxu3 %v165_v51  ;;  %272 = vmatpush.msra.mxu1 %v185_v55 }
  0x33   :  { %258 = vmatpush.msra.mxu0 %v166_v52  ;;  %239 = vmatmul.f32.vlgmr.msra.gmra.mxu3 %v558_v53 }
  0x34   :  { %259 = vmatmul.f32.vlgmr.msra.gmra.mxu0 %v558_v53  ;;  %273 = vmatpush.msra.mxu1 %v182_v56 }
  0x36   :  { %274 = vmatpush.msra.mxu1 %v179_v57 }
  0x38   :  { %275 = vmatpush.msra.mxu1 %v176_v58 }
  0x3a   :  { %276 = vmatpush.msra.mxu1 %v173_v59 }
  0x3c   :  { %277 = vmatpush.msra.mxu1 %v170_v60 }
  0x3e   :  { %278 = vmatpush.msra.mxu1 %v167_v61 }
  0x3f   :  { %279 = vmatmul.f32.vlgmr.msra.gmra.mxu1 %v558_v53 }
  0xa0   :  { %v122_v62 = vpop.f32.mrf.mxu2 }
  0xa1   :  { %v123_v10 = vadd.f32 %v122_v62, %v95_v6 }
  0xa8   :  { %v142_v2 = vpop.f32.mrf.mxu2 }
  0xa9   :  { %v143_v4 = vadd.f32 %v142_v2, %v96_v1 }
  0xb1   :  { %v260_v5 = vpop.f32.mrf.mxu0 }
  0xb2   :  { %v261_v7 = vadd.f32 %v260_v5, %v218_v3  ;;  %v162_v32 = vpop.f32.mrf.mxu2 }
  0xb3   :  { %v163_v38 = vadd.f32 %v162_v32, %v97_v31 }
  0xb4   :  { %v303_v8 = vadd.f32 %v261_v7, %v143_v4 }
  0xb6   :  { %v354_v11 = vmul.f32 -1.442695, %v303_v8  ;;  %v240_v12 = vpop.f32.mrf.mxu3 }
  0xb7   :  { %v241_v13 = vadd.f32 %v240_v12, %v217_v9 }
  0xb8   :  { %362 = vpow2.f32 %v354_v11 }
  0xb9   :  { %v283_v14 = vadd.f32 %v241_v13, %v123_v10 }
  0xbb   :  { %v353_v15 = vmul.f32 -1.442695, %v283_v14 }
  0xbc   :  { %v280_v27 = vpop.f32.mrf.mxu1 }
  0xbd   :  { %364 = vpow2.f32 %v353_v15  ;;  %v281_v34 = vadd.f32 %v280_v27, %v219_v25 }
  0xbe   :  { %v363_v16 = vpop.eup %362 }
  0xbf   :  { %v307_v17 = vadd.f32 1.0, %v363_v16 }
  0xc1   :  { %366 = vrcp.f32 %v307_v17  ;;  %vm313_vm4 = vweird.f32 %v307_v17  ;;  %v319_v39 = vand.u32 2147483648, %v307_v17  ;;  %v317_v42 = vand.u32 2147483647, %v307_v17 }
  0xc3   :  { %v365_v18 = vpop.eup %364  ;;  %v320_v45 = vor.u32 1.1754944e-38, %v319_v39  ;;  %vm318_vm8 = vcmp.eq.f32.partialorder %v317_v42, 8.507059e+37 }
  0xc4   :  { %v287_v19 = vadd.f32 1.0, %v365_v18 }
  0xc6   :  { %368 = vrcp.f32 %v287_v19  ;;  %v299_v28 = vand.u32 2147483648, %v287_v19  ;;  %v297_v30 = vand.u32 2147483647, %v287_v19  ;;  %vm293_vm2 = vweird.f32 %v287_v19 }
  0xc7   :  { %v367_v20 = vpop.eup %366 }
  0xc8   :  { %v309_v21 = vmul.f32 %v367_v20, %v307_v17  ;;  %v300_v36 = vor.u32 1.1754944e-38, %v299_v28  ;;  %vm314_vm5 = vweird.f32 %v367_v20  ;;  %vm298_vm6 = vcmp.eq.f32.partialorder %v297_v30, 8.507059e+37 }
  0xc9   :  { %vm315_vm7 = vmor %vm313_vm4, %vm314_vm5 }
  0xca   :  { %v310_v24 = vsub.f32 1.0, %v309_v21 }
  0xcc   :  { %v369_v22 = vpop.eup %368  ;;  %v311_v33 = vmul.f32 %v367_v20, %v310_v24 }
  0xcd   :  { %v289_v23 = vmul.f32 %v369_v22, %v287_v19  ;;  %vm294_vm1 = vweird.f32 %v369_v22 }
  0xce   :  { %vm295_vm3 = vmor %vm293_vm2, %vm294_vm1  ;;  %v312_v41 = vadd.f32 %v367_v20, %v311_v33 }
  0xcf   :  { %v290_v26 = vsub.f32 1.0, %v289_v23 }
  0xd0   :  { %v316_v46 = vsel %vm315_vm7, %v367_v20, %v312_v41 }
  0xd1   :  { %v291_v29 = vmul.f32 %v369_v22, %v290_v26  ;;  %v321_v47 = vsel %vm318_vm8, %v320_v45, %v316_v46 }
  0xd2   :  { %v326_v48 = vsub.f32 1.0, %v321_v47  ;;  %v328_v51 = vmul.f32 %v321_v47, %v558_v53 }
  0xd3   :  { %v292_v35 = vadd.f32 %v369_v22, %v291_v29 }
  0xd5   :  { %v296_v37 = vsel %vm295_vm3, %v369_v22, %v292_v35 }
  0xd6   :  { %v301_v40 = vsel %vm298_vm6, %v300_v36, %v296_v37 }
  0xd7   :  { %v323_v43 = vmul.f32 %v301_v40, %v281_v34 }
  0xd9   :  { %v324_v44 = vadd.f32 %v323_v43, %v163_v38 }
  0xdb   :  { %370 = vtanh.f32 %v324_v44 }
  0xe1   :  { %v371_v49 = vpop.eup %370 }
  0xe2   :  { %v327_v50 = vmul.f32 %v371_v49, %v326_v48 }
  0xe4   :  { %v329_v52 = vadd.f32 %v328_v51, %v327_v50 }
  0xe6   :  { %330 = vst [vmem:[#allocation10] sm:$0x1] %v329_v52 }
  0xe7   :  { %341 = dma.vmem_to_hbm [thread:$0]  %s337_s13, 16, %s339_s16, [#allocation4]  }
  0xe8   :  { %498 = dma.done.wait [#allocation4], 16  }
  0xe9   :  { %499 = vsyncadd [#allocation4], 4294967280 }
  0xea   :  { %346 = vsyncpa [#allocation3], 1 }
  0xeb   :  { %347 = vsyncpa [#allocation6], 1 }
  0xec   :  { %348 = vsyncpa [#allocation9], 1 }
  0xed   :  { %349 = vsyncpa [#allocation4], 1 }

</bundles_post_ra>
